<compile_context>
chip_gen: v7x
topology: tpu7x:2x2x1
jax: 0.10.0
libtpu: 0.0.40
codegen_flags: <defaults>
</compile_context>

<pallas_src>
import functools

import jax
import jax.numpy as jnp
from jax.experimental import pallas as pl
from jax.experimental.pallas import tpu as pltpu


def _round_up(n, m):
    return ((n + m - 1) // m) * m


def _mlp_kernel(xT_ref, w1_ref, b1_ref, w2_ref, b2_ref, wo_ref, bo_ref, oT_ref):
    """Fused transposed-layout MLP forward for one batch tile.

    Shapes (batch on the 128-lane axis):
      xT_ref : (input_dim, TILE_B)   bf16   streamed per grid step
      wK_ref : (out_k, in_k)         bf16   VMEM-resident (PyTorch layout)
      bK_ref : (out_k, 1)            f32    VMEM-resident
      oT_ref : (output_dim, TILE_B)  f32    lane-dense output tile
    """
    xT = xT_ref[...]

    # Layer 1: (h1, in) @ (in, TILE_B) -> (h1, TILE_B); f32 accumulation on MXU.
    h = jnp.dot(w1_ref[...], xT, preferred_element_type=jnp.float32) + b1_ref[...]
    h = jnp.maximum(h, 0.0).astype(w2_ref.dtype)      # ReLU in f32, bf16 into MXU

    # Layer 2
    h = jnp.dot(w2_ref[...], h, preferred_element_type=jnp.float32) + b2_ref[...]
    h = jnp.maximum(h, 0.0).astype(wo_ref.dtype)

    # Output layer (no activation)
    out = jnp.dot(wo_ref[...], h, preferred_element_type=jnp.float32) + bo_ref[...]
    oT_ref[...] = out.astype(oT_ref.dtype)


@functools.partial(jax.jit, static_argnames=("tile_b",))
def q_neural_estimator_forward(x, w1, b1, w2, b2, wo, bo, *, tile_b=1024):
    """Pallas-backed forward pass.

    Args:
      x:  (B, input_dim) float32
      w1: (h1, input_dim), b1: (h1,)        -- PyTorch nn.Linear layout
      w2: (h2, h1),        b2: (h2,)
      wo: (out_dim, h2),   bo: (out_dim,)
    Returns:
      (B, out_dim) float32
    """
    B, input_dim = x.shape
    h1 = w1.shape[0]
    h2 = w2.shape[0]
    out_dim = wo.shape[0]

    # Batch tile lives on the 128-lane axis; pad B up to a multiple of the tile.
    tb = min(tile_b, _round_up(B, 128))
    B_pad = _round_up(B, tb)
    n_tiles = B_pad // tb

    cdt = jnp.bfloat16  # stream / MXU-input dtype; accumulation stays f32
    xT = jnp.pad(x, ((0, B_pad - B), (0, 0))).T.astype(cdt)          # (input_dim, B_pad)
    w1c = w1.astype(cdt)
    w2c = w2.astype(cdt)
    woc = wo.astype(cdt)
    b1c = b1.reshape(h1, 1).astype(jnp.float32)
    b2c = b2.reshape(h2, 1).astype(jnp.float32)
    boc = bo.reshape(out_dim, 1).astype(jnp.float32)

    def resident(shape):  # full-array block, constant index -> stays in VMEM
        return pl.BlockSpec(shape, lambda i: (0, 0))

    flops = 2 * B_pad * (input_dim * h1 + h1 * h2 + h2 * out_dim)
    bytes_accessed = (
        xT.size * xT.dtype.itemsize
        + B_pad * out_dim * 4
        + sum(a.size * a.dtype.itemsize for a in (w1c, w2c, woc, b1c, b2c, boc))
    )

    outT = pl.pallas_call(
        _mlp_kernel,
        out_shape=jax.ShapeDtypeStruct((out_dim, B_pad), jnp.float32),
        grid=(n_tiles,),
        in_specs=[
            pl.BlockSpec((input_dim, tb), lambda i: (0, i)),   # streamed x^T tile
            resident((h1, input_dim)),
            resident((h1, 1)),
            resident((h2, h1)),
            resident((h2, 1)),
            resident((out_dim, h2)),
            resident((out_dim, 1)),
        ],
        out_specs=pl.BlockSpec((out_dim, tb), lambda i: (0, i)),
        compiler_params=pltpu.CompilerParams(
            dimension_semantics=("parallel",),       # megacore split on v7x
            vmem_limit_bytes=32 * 1024 * 1024,
        ),
        cost_estimate=pl.CostEstimate(
            flops=flops, transcendentals=0, bytes_accessed=bytes_accessed),
    )(xT, w1c, b1c, w2c, b2c, woc, boc)

    return outT.T[:B]  # back to (B, out_dim), drop padded rows


def init_params(key, input_dim, hidden_layer_size, output_dim):
    """Mimics nn.Linear init: U(-1/sqrt(fan_in), 1/sqrt(fan_in)); (out, in) layout."""
    dims = [input_dim] + list(hidden_layer_size) + [output_dim]
    params = []
    for i in range(len(dims) - 1):
        fan_in, fan_out = dims[i], dims[i + 1]
        key, kw, kb = jax.random.split(key, 3)
        bound = 1.0 / (fan_in ** 0.5)
        w = jax.random.uniform(kw, (fan_out, fan_in), jnp.float32, -bound, bound)
        b = jax.random.uniform(kb, (fan_out,), jnp.float32, -bound, bound)
        params.append((w, b))
    return params


if __name__ == "__main__":
    # CartPole-v0 sizing: state dim 4, two hidden layers of 16, 2 actions.
    input_dim = 4
    hidden_layer_size = [16, 16]
    output_dim = 2
    batch = 2

    key = jax.random.PRNGKey(0)
    key, kx = jax.random.split(key)
    x = jax.random.normal(kx, (batch, input_dim), dtype=jnp.float32)

    (w1, b1), (w2, b2), (wo, bo) = init_params(
        key, input_dim, hidden_layer_size, output_dim)

    out = q_neural_estimator_forward(x, w1, b1, w2, b2, wo, bo)
    out = jax.block_until_ready(out)
    assert out.shape == (batch, output_dim)

    # Pure-JAX reference with the same bf16-rounded streams (f32 accumulation),
    # matching the kernel's numerics.
    f32 = lambda a: a.astype(jnp.bfloat16).astype(jnp.float32)
    hp = jax.lax.Precision.HIGHEST
    ref = jnp.maximum(jnp.dot(f32(x), f32(w1).T, precision=hp) + b1, 0.0)
    ref = jnp.maximum(jnp.dot(f32(ref), f32(w2).T, precision=hp) + b2, 0.0)
    ref = jnp.dot(f32(ref), f32(wo).T, precision=hp) + bo
    assert jnp.allclose(out, ref, atol=1e-4, rtol=1e-4), "mismatch vs reference"

    print("KERNEL_OK")
</pallas_src>

<mosaic_0001>
module attributes {stable_mosaic.version = 11 : i64} {
  func.func @_mlp_kernel(%arg0: i32, %arg1: memref<4x128xbf16, #tpu.memory_space<vmem>>, %arg2: memref<16x4xbf16, #tpu.memory_space<vmem>>, %arg3: memref<16x1xf32, #tpu.memory_space<vmem>>, %arg4: memref<16x16xbf16, #tpu.memory_space<vmem>>, %arg5: memref<16x1xf32, #tpu.memory_space<vmem>>, %arg6: memref<2x16xbf16, #tpu.memory_space<vmem>>, %arg7: memref<2x1xf32, #tpu.memory_space<vmem>>, %arg8: memref<2x128xf32, #tpu.memory_space<vmem>>) attributes {dimension_semantics = [#tpu.dimension_semantics<parallel>], iteration_bounds = array<i64: 1>, scalar_prefetch = 0 : i64, scratch_operands = 0 : i64, tpu.core_type = #tpu.core_type<tc>, window_params = [{transform_indices = @transform_0, window_bounds = array<i64: 4, 128>}, {pipeline_mode = #tpu.pipeline_mode<synchronous>, transform_indices = @transform_1, window_bounds = array<i64: 16, 4>}, {pipeline_mode = #tpu.pipeline_mode<synchronous>, transform_indices = @transform_2, window_bounds = array<i64: 16, 1>}, {pipeline_mode = #tpu.pipeline_mode<synchronous>, transform_indices = @transform_3, window_bounds = array<i64: 16, 16>}, {pipeline_mode = #tpu.pipeline_mode<synchronous>, transform_indices = @transform_4, window_bounds = array<i64: 16, 1>}, {pipeline_mode = #tpu.pipeline_mode<synchronous>, transform_indices = @transform_5, window_bounds = array<i64: 2, 16>}, {pipeline_mode = #tpu.pipeline_mode<synchronous>, transform_indices = @transform_6, window_bounds = array<i64: 2, 1>}, {transform_indices = @transform_7, window_bounds = array<i64: 2, 128>}]} {
    %c0 = arith.constant 0 : index
    %c0_0 = arith.constant 0 : index
    %0 = vector.load %arg1[%c0, %c0_0] : memref<4x128xbf16, #tpu.memory_space<vmem>>, vector<4x128xbf16>
    %c0_1 = arith.constant 0 : index
    %c0_2 = arith.constant 0 : index
    %1 = vector.load %arg2[%c0_1, %c0_2] : memref<16x4xbf16, #tpu.memory_space<vmem>>, vector<16x4xbf16>
    %cst = arith.constant dense<0.000000e+00> : vector<16x128xf32>
    %2 = tpu.matmul %1, %0, %cst {dimension_numbers = #tpu.dot_dimension_numbers<[1], [0], [0], [1], [0, 0, 1, 1], [], []>} : vector<16x4xbf16>, vector<4x128xbf16>, vector<16x128xf32> -> vector<16x128xf32>
    %c0_3 = arith.constant 0 : index
    %c0_4 = arith.constant 0 : index
    %3 = vector.load %arg3[%c0_3, %c0_4] : memref<16x1xf32, #tpu.memory_space<vmem>>, vector<16x1xf32>
    %4 = vector.broadcast %3 : vector<16x1xf32> to vector<16x128xf32>
    %5 = arith.addf %2, %4 : vector<16x128xf32>
    %cst_5 = arith.constant 0.000000e+00 : f32
    %6 = vector.broadcast %cst_5 : f32 to vector<16x128xf32>
    %7 = arith.maximumf %5, %6 : vector<16x128xf32>
    %8 = arith.truncf %7 : vector<16x128xf32> to vector<16x128xbf16>
    %c0_6 = arith.constant 0 : index
    %c0_7 = arith.constant 0 : index
    %9 = vector.load %arg4[%c0_6, %c0_7] : memref<16x16xbf16, #tpu.memory_space<vmem>>, vector<16x16xbf16>
    %cst_8 = arith.constant dense<0.000000e+00> : vector<16x128xf32>
    %10 = tpu.matmul %9, %8, %cst_8 {dimension_numbers = #tpu.dot_dimension_numbers<[1], [0], [0], [1], [0, 0, 1, 1], [], []>} : vector<16x16xbf16>, vector<16x128xbf16>, vector<16x128xf32> -> vector<16x128xf32>
    %c0_9 = arith.constant 0 : index
    %c0_10 = arith.constant 0 : index
    %11 = vector.load %arg5[%c0_9, %c0_10] : memref<16x1xf32, #tpu.memory_space<vmem>>, vector<16x1xf32>
    %12 = vector.broadcast %11 : vector<16x1xf32> to vector<16x128xf32>
    %13 = arith.addf %10, %12 : vector<16x128xf32>
    %cst_11 = arith.constant 0.000000e+00 : f32
    %14 = vector.broadcast %cst_11 : f32 to vector<16x128xf32>
    %15 = arith.maximumf %13, %14 : vector<16x128xf32>
    %16 = arith.truncf %15 : vector<16x128xf32> to vector<16x128xbf16>
    %c0_12 = arith.constant 0 : index
    %c0_13 = arith.constant 0 : index
    %17 = vector.load %arg6[%c0_12, %c0_13] : memref<2x16xbf16, #tpu.memory_space<vmem>>, vector<2x16xbf16>
    %cst_14 = arith.constant dense<0.000000e+00> : vector<2x128xf32>
    %18 = tpu.matmul %17, %16, %cst_14 {dimension_numbers = #tpu.dot_dimension_numbers<[1], [0], [0], [1], [0, 0, 1, 1], [], []>} : vector<2x16xbf16>, vector<16x128xbf16>, vector<2x128xf32> -> vector<2x128xf32>
    %c0_15 = arith.constant 0 : index
    %c0_16 = arith.constant 0 : index
    %19 = vector.load %arg7[%c0_15, %c0_16] : memref<2x1xf32, #tpu.memory_space<vmem>>, vector<2x1xf32>
    %20 = vector.broadcast %19 : vector<2x1xf32> to vector<2x128xf32>
    %21 = arith.addf %18, %20 : vector<2x128xf32>
    %c0_17 = arith.constant 0 : index
    %c0_18 = arith.constant 0 : index
    %22 = vector.load %arg8[%c0_17, %c0_18] : memref<2x128xf32, #tpu.memory_space<vmem>>, vector<2x128xf32>
    tpu.vector_store %arg8[%c0_17, %c0_18], %21 {strides = array<i32>} : memref<2x128xf32, #tpu.memory_space<vmem>>, vector<2x128xf32>,
    return
  }
  func.func @transform_0(%arg0: i32) -> (i32, i32) {
    %c0_i32 = arith.constant 0 : i32
    %c0_i32_0 = arith.constant 0 : i32
    return %c0_i32, %arg0 : i32, i32
  }
  func.func @transform_1(%arg0: i32) -> (i32, i32) {
    %c0_i32 = arith.constant 0 : i32
    %c0_i32_0 = arith.constant 0 : i32
    %c0_i32_1 = arith.constant 0 : i32
    return %c0_i32, %c0_i32_0 : i32, i32
  }
  func.func @transform_2(%arg0: i32) -> (i32, i32) {
    %c0_i32 = arith.constant 0 : i32
    %c0_i32_0 = arith.constant 0 : i32
    %c0_i32_1 = arith.constant 0 : i32
    return %c0_i32, %c0_i32_0 : i32, i32
  }
  func.func @transform_3(%arg0: i32) -> (i32, i32) {
    %c0_i32 = arith.constant 0 : i32
    %c0_i32_0 = arith.constant 0 : i32
    %c0_i32_1 = arith.constant 0 : i32
    return %c0_i32, %c0_i32_0 : i32, i32
  }
  func.func @transform_4(%arg0: i32) -> (i32, i32) {
    %c0_i32 = arith.constant 0 : i32
    %c0_i32_0 = arith.constant 0 : i32
    %c0_i32_1 = arith.constant 0 : i32
    return %c0_i32, %c0_i32_0 : i32, i32
  }
  func.func @transform_5(%arg0: i32) -> (i32, i32) {
    %c0_i32 = arith.constant 0 : i32
    %c0_i32_0 = arith.constant 0 : i32
    %c0_i32_1 = arith.constant 0 : i32
    return %c0_i32, %c0_i32_0 : i32, i32
  }
  func.func @transform_6(%arg0: i32) -> (i32, i32) {
    %c0_i32 = arith.constant 0 : i32
    %c0_i32_0 = arith.constant 0 : i32
    %c0_i32_1 = arith.constant 0 : i32
    return %c0_i32, %c0_i32_0 : i32, i32
  }
  func.func @transform_7(%arg0: i32) -> (i32, i32) {
    %c0_i32 = arith.constant 0 : i32
    %c0_i32_0 = arith.constant 0 : i32
    return %c0_i32, %arg0 : i32, i32
  }
}

</mosaic_0001>

<bundles_post_ra>
// kernel: q_neural_estimator_forward.1
= control target key start
LH: loop header
LB: loop body
LE: loop exit
PB: predicated region body
PF: predicated region fallthrough
CT: control target
= control target key end

     0   :  { %vm51_vm0 = vcmask 1041408   ;;  %v257_v0 = vmov 0.0   ;;  %vm258_vm1 = vmmov 0   ;;  %vm47_vm2 = vcmask 31744   ;;  %s335_s0 = inlined_call_operand.vmem [shape: bf16[4,128], index: 0, kind: input, shape index: {}]   ;;  %s336_s1 = inlined_call_operand.vmem [shape: bf16[16,4], index: 1, kind: input, shape index: {}]   ;;  %s337_s2 = inlined_call_operand.vmem [shape: f32[16,1], index: 2, kind: input, shape index: {}]   ;;  %s338_s6 = inlined_call_operand.vmem [shape: f32[2,1], index: 6, kind: input, shape index: {}]   ;;  %s339_s3 = inlined_call_operand.vmem [shape: bf16[16,16], index: 3, kind: input, shape index: {}]   ;;  %s340_s4 = inlined_call_operand.vmem [shape: f32[16,1], index: 4, kind: input, shape index: {}]   ;;  %s341_s5 = inlined_call_operand.vmem [shape: bf16[2,16], index: 5, kind: input, shape index: {}]   ;;  %s342_s7 = inlined_call_operand.vmem [shape: f32[2,128], index: 7, kind: output, shape index: {}]  }
   0x1   :  { %232 = vmatprep.subr.bf16.mxu0 %v257_v0  ;;  %v27_v1 = vld [vmem:[%s335_s0] sm:$0x3]  ;;  %234 = vmatprep.mubr.msk.bf16.mxu0 %vm258_vm1, %v257_v0  ;;  %v259_v5 = vmov 0   ;;  %v31_v6 = vld [vmem:[%s337_s2 + $0x8] sm:$0xff]  ;;  %vm118_vm3 = vcmask 130048  }
   0x2   :  { %v53_v2 = vsel %vm51_vm0, %v27_v1, 0  ;;  %v255_v3 = vld [vmem:[%s336_s1] sm:$0xff]   ;;  %238 = vmatprep.subr.bf16.mxu1 %v257_v0  ;;  %240 = vmatprep.mubr.msk.bf16.mxu1 %vm258_vm1, %v257_v0  ;;  %v102_v9 = vld [vmem:[%s340_s4 + $0x8] sm:$0xff] }
   0x3   :  { %v30_v4 = vld [vmem:[%s337_s2] sm:$0xff]  ;;  %233 = vmatpush3.bf16.msra.mxu0 %v53_v2  ;;  %253 = vset.pattern.permute.xlu0 %v259_v5 }
   0x4   :  { %34 = vperm.xlu0 %253, %v30_v4   ;;  %254 = vset.pattern.permute.xlu1 %v259_v5  ;;  %v167_v7 = vld [vmem:[%s338_s6] sm:$0x3] }
   0x5   :  { %244 = vmatprep.subr.bf16.mxu0 %v257_v0  ;;  %v101_v8 = vld [vmem:[%s340_s4] sm:$0xff] }
   0x6   :  { %235 = vmatmul.mubr.msk.bf16.vlgmr.msra.gmra.mrb[0].mxu0 %vm47_vm2, %v255_v3  ;;  %105 = vperm.xlu1 %254, %v101_v8   ;;  %v256_v21 = vld [vmem:[%s339_s3] sm:$0xff]  }
   0x7   :  { %246 = vmatprep.mubr.msk.bf16.mxu0 %vm258_vm1, %v257_v0  ;;  %v166_v33 = vld [vmem:[%s341_s5] sm:$0x1] }
   0x8   :  { %39 = vperm.xlu0 %253, %v31_v6  }
   0xa   :  { %110 = vperm.xlu1 %254, %v102_v9  }
   0xc   :  { %170 = vperm.xlu0 %253, %v167_v7  }
  0x83   :  { %v35_v10 = vpop.permute.xlu0 %34 }
  0x85   :  { %v106_v22 = vpop.permute.xlu1 %105 }
  0x87   :  { %v40_v14 = vpop.permute.xlu0 %39 }
  0x89   :  { %v111_v26 = vpop.permute.xlu1 %110 }
  0x8b   :  { %v171_v34 = vpop.permute.xlu0 %170 }
  0xd9   :  { %v89_v11 = vpop.f32.mrb[0].mxu0 }
  0xda   :  { %v90_v12 = vadd.f32 %v89_v11, %v35_v10  ;;  %v236_v13 = vpop.f32.mrb[1].mxu0 }
  0xdb   :  { %v92_v15 = vpop.f32.mrb[2].mxu0 }
  0xdc   :  { %v93_v16 = vadd.f32 %v92_v15, %v40_v14  ;;  %v237_v17 = vpop.f32.mrb[3].mxu0  ;;  %v96_v18 = vmax.f32 %v90_v12, 0.0 }
  0xde   :  { %v97_v19 = vmax.f32 %v93_v16, 0.0 }
  0xe0   :  { %v98_v20 = vpack.c.bf16 %v97_v19, %v96_v18 }
  0xe2   :  { %239 = vmatpush3.bf16.msra.mxu1 %v98_v20 }
  0xe5   :  { %241 = vmatmul.mubr.msk.bf16.vlgmr.msra.gmra.mrb[0].mxu1 %vm118_vm3, %v256_v21 }
 0x1b8   :  { %v156_v23 = vpop.f32.mrb[0].mxu1 }
 0x1b9   :  { %v157_v24 = vadd.f32 %v156_v23, %v106_v22  ;;  %v242_v25 = vpop.f32.mrb[1].mxu1 }
 0x1ba   :  { %v159_v27 = vpop.f32.mrb[2].mxu1 }
 0x1bb   :  { %v160_v28 = vadd.f32 %v159_v27, %v111_v26  ;;  %v243_v29 = vpop.f32.mrb[3].mxu1  ;;  %v163_v30 = vmax.f32 %v157_v24, 0.0 }
 0x1bd   :  { %v164_v31 = vmax.f32 %v160_v28, 0.0 }
 0x1bf   :  { %v165_v32 = vpack.c.bf16 %v164_v31, %v163_v30 }
 0x1c1   :  { %245 = vmatpush3.bf16.msra.mxu0 %v165_v32 }
 0x1c4   :  { %247 = vmatmul.mubr.msk.bf16.vlgmr.msra.gmra.mrb[4].mxu0 %vm118_vm3, %v166_v33 }
 0x297   :  { %v210_v35 = vpop.f32.mrb[4].mxu0 }
 0x298   :  { %v211_v36 = vadd.f32 %v210_v35, %v171_v34  ;;  %v248_v37 = vpop.f32.mrb[5].mxu0 }
 0x299   :  { %v213_v38 = vpop.f32.mrb[6].mxu0 }
 0x29a   :  { %216 = vst [vmem:[%s342_s7] sm:$0x3] %v211_v36  ;;  %v249_v39 = vpop.f32.mrb[7].mxu0 }

</bundles_post_ra>
